<compile_context>
chip_gen: v7x
topology: tpu7x:2x2x1
jax: 0.10.0
libtpu: 0.0.40
codegen_flags: <defaults>
</compile_context>

<pallas_src>
import functools

import jax
import jax.numpy as jnp
from jax.experimental import pallas as pl
from jax.experimental.pallas import tpu as pltpu

LEAKY_SLOPE = 0.1
BN_EPS = 1e-5


def _leaky(v):
    return jnp.where(v > 0, v, LEAKY_SLOPE * v)


def _round_up(x, m):
    return ((x + m - 1) // m) * m


def _stack_to_head_kernel(x_ref, w1_ref, b1_ref, w2_ref, b2_ref, w3_ref, b3_ref,
                          ml_ref, mr_ref, o_ref, pad_ref, col_ref,
                          *, H, W, pad_left, C1P):
    # Shapes (per grid step, one image):
    #   x_ref  : (1, Cin, HW)        w1_ref: (C1, Cin)     b1_ref: (C1, 1)
    #   w2_ref : (C2, 9*C1P)         b2_ref: (C2, 1)
    #   w3_ref : (C3, C2)            b3_ref: (C3, 1)
    #   ml_ref/mr_ref: (1, HW) f32 column-validity masks for dx=-1 / dx=+1 taps
    #   o_ref  : (1, C3, HW)
    #   pad_ref: (C1, pad_left + HW + pad_left) persistent zero-bordered scratch
    #   col_ref: (9*C1P, HW) im2col scratch (tap-major, sublane-aligned blocks)
    HW = H * W
    C1 = w1_ref.shape[0]

    x = x_ref[0]                                                     # (Cin, HW)

    # ---- layer 1: 1x1 conv (+ folded BN) + leaky relu ------------------------------
    h1 = _leaky(jnp.dot(w1_ref[...], x, preferred_element_type=jnp.float32)
                + b1_ref[...])                                       # (C1, HW)

    # ---- layer 2: 3x3 conv, padding=1 (+ folded BN) + leaky relu --------------------
    # Zero only the aligned 128-multiple borders; write h1 into the aligned interior.
    # (Re-zeroed every step so the kernel stays correct if the "parallel" batch axis
    #  is sharded across TensorCores with per-core scratch.)
    zeros_border = jnp.zeros((C1, pad_left), jnp.float32)
    pad_ref[:, pl.ds(0, pad_left)] = zeros_border
    pad_ref[:, pl.ds(pad_left + HW, pad_left)] = zeros_border
    pad_ref[:, pl.ds(pad_left, HW)] = h1
    padded = pad_ref[...]                                            # (C1, 2*pad_left+HW)

    # Build the im2col matrix: tap t occupies rows [t*C1P, t*C1P + C1); the
    # C1..C1P-1 padding rows stay zero (matching zero weight columns) so the
    # whole 3x3 conv becomes a single (C2, 9*C1P) @ (9*C1P, HW) matmul.
    col_ref[...] = jnp.zeros_like(col_ref)
    ml = ml_ref[...]                                                 # (1, HW)
    mr = mr_ref[...]                                                 # (1, HW)
    for ky in range(3):                                              # statically unrolled
        for kx in range(3):
            t = ky * 3 + kx
            start = pad_left + (ky - 1) * W + (kx - 1)               # static lane offset
            patch = padded[:, start:start + HW]                      # (C1, HW)
            if kx == 0:                                              # dx = -1: mask x == 0
                patch = patch * ml
            elif kx == 2:                                            # dx = +1: mask x == W-1
                patch = patch * mr
            col_ref[pl.ds(t * C1P, C1), :] = patch

    h2 = _leaky(jnp.dot(w2_ref[...], col_ref[...],
                        preferred_element_type=jnp.float32)
                + b2_ref[...])                                       # (C2, HW)

    # ---- layer 3: 1x1 conv (+ folded BN) + leaky relu ------------------------------
    h3 = _leaky(jnp.dot(w3_ref[...], h2, preferred_element_type=jnp.float32)
                + b3_ref[...])                                       # (C3, HW)
    o_ref[0] = h3


def stack_to_head_pallas(x_nchw, params):
    """x_nchw: (N, Cin, H, W) float32.  Returns (N, Cout, H, W)."""
    w1, b1, w2col, b2, w3, b3 = params     # (C1,Cin),(C1,1),(C2,9*C1P),(C2,1),(C3,C2),(C3,1)
    N, Cin, H, W = x_nchw.shape
    HW = H * W
    C1 = w1.shape[0]
    C2 = w2col.shape[0]
    C3 = w3.shape[0]
    C1P = w2col.shape[1] // 9

    # NCHW -> (N, C, H*W): pure reshape, no transpose needed for this layout.
    x = x_nchw.reshape(N, Cin, HW).astype(jnp.float32)

    # Column-validity masks (constant across the grid): computed once outside the kernel.
    col = jnp.arange(HW, dtype=jnp.int32) % W
    mask_l = (col > 0).astype(jnp.float32).reshape(1, HW)        # valid source for dx = -1
    mask_r = (col < (W - 1)).astype(jnp.float32).reshape(1, HW)  # valid source for dx = +1

    pad_left = _round_up(W + 1, 128)                 # aligned border width (>= W+1)
    pad_total = 2 * pad_left + HW

    kernel = functools.partial(_stack_to_head_kernel, H=H, W=W,
                               pad_left=pad_left, C1P=C1P)

    out_flat = pl.pallas_call(
        kernel,
        out_shape=jax.ShapeDtypeStruct((N, C3, HW), jnp.float32),
        grid_spec=pltpu.PrefetchScalarGridSpec(
            num_scalar_prefetch=0,
            grid=(N,),
            in_specs=[
                pl.BlockSpec((1, Cin, HW), lambda n: (n, 0, 0)),
                pl.BlockSpec((C1, Cin), lambda n: (0, 0)),
                pl.BlockSpec((C1, 1), lambda n: (0, 0)),
                pl.BlockSpec((C2, 9 * C1P), lambda n: (0, 0)),
                pl.BlockSpec((C2, 1), lambda n: (0, 0)),
                pl.BlockSpec((C3, C2), lambda n: (0, 0)),
                pl.BlockSpec((C3, 1), lambda n: (0, 0)),
                pl.BlockSpec((1, HW), lambda n: (0, 0)),
                pl.BlockSpec((1, HW), lambda n: (0, 0)),
            ],
            out_specs=pl.BlockSpec((1, C3, HW), lambda n: (n, 0, 0)),
            scratch_shapes=[
                pltpu.VMEM((C1, pad_total), jnp.float32),     # zero-bordered padded h1
                pltpu.VMEM((9 * C1P, HW), jnp.float32),       # im2col matrix
            ],
        ),
        compiler_params=pltpu.CompilerParams(dimension_semantics=("parallel",)),
    )(x, w1, b1, w2col, b2, w3, b3, mask_l, mask_r)

    return out_flat.reshape(N, C3, H, W)             # already NCHW


def _fold_bn(w_hwio, gamma, beta, mean, var):
    """Fold BatchNorm (eval mode) into conv weights + bias. w_hwio: (kH,kW,Cin,Cout)."""
    scale = gamma / jnp.sqrt(var + BN_EPS)
    w_folded = w_hwio * scale[None, None, None, :]
    b_folded = beta - mean * scale
    return w_folded, b_folded


def make_params(key, input_channel, first_head=True):
    if first_head:
        half = input_channel // 2
    else:
        half = input_channel // 3
    mid = 2 * half

    def conv_bn(key, k, cin, cout):
        kw, kg, kb, km, kv = jax.random.split(key, 5)
        w = jax.random.normal(kw, (k, k, cin, cout), jnp.float32) * 0.1
        gamma = 1.0 + 0.1 * jax.random.normal(kg, (cout,), jnp.float32)
        beta = 0.1 * jax.random.normal(kb, (cout,), jnp.float32)
        mean = 0.1 * jax.random.normal(km, (cout,), jnp.float32)
        var = jnp.abs(jax.random.normal(kv, (cout,), jnp.float32)) + 0.5
        return _fold_bn(w, gamma, beta, mean, var)

    k1, k2, k3 = jax.random.split(key, 3)
    w1, b1 = conv_bn(k1, 1, input_channel, half)   # (1,1,Cin,C1)
    w2, b2 = conv_bn(k2, 3, half, mid)             # (3,3,C1,C2)
    w3, b3 = conv_bn(k3, 1, mid, half)             # (1,1,C2,C3)

    C1, C2 = half, mid
    C1P = _round_up(C1, 8)

    # Pack the 3x3 weights for the im2col matmul: w2col[o, t*C1P + c] = w2[ky, kx, c, o]
    # with tap t = ky*3 + kx; the c in [C1, C1P) padding columns are zero.
    w2_taps = jnp.transpose(w2.reshape(9, C1, C2), (0, 2, 1))        # (9, C2, C1)
    w2_taps = jnp.pad(w2_taps, ((0, 0), (0, 0), (0, C1P - C1)))      # (9, C2, C1P)
    w2col = jnp.transpose(w2_taps, (1, 0, 2)).reshape(C2, 9 * C1P)   # (C2, 9*C1P)

    # Kernel layout: 1x1 weights as (Cout, Cin); biases as (Cout, 1).
    params_kernel = (
        jnp.transpose(w1.reshape(input_channel, half)),        # (C1, Cin)
        b1.reshape(half, 1),
        w2col,                                                  # (C2, 9*C1P)
        b2.reshape(mid, 1),
        jnp.transpose(w3.reshape(mid, half)),                   # (C3, C2)
        b3.reshape(half, 1),
    )
    params_hwio = (w1, b1, w2, b2, w3, b3)
    return params_kernel, params_hwio


def ref_forward(x_nchw, params_hwio):
    """Pure-JAX reference using lax.conv (for verification only)."""
    w1, b1, w2, b2, w3, b3 = params_hwio
    x = jnp.transpose(x_nchw, (0, 2, 3, 1))
    dn = ("NHWC", "HWIO", "NHWC")
    h = _leaky(jax.lax.conv_general_dilated(x, w1, (1, 1), "SAME", dimension_numbers=dn) + b1)
    h = _leaky(jax.lax.conv_general_dilated(h, w2, (1, 1), "SAME", dimension_numbers=dn) + b2)
    h = _leaky(jax.lax.conv_general_dilated(h, w3, (1, 1), "SAME", dimension_numbers=dn) + b3)
    return jnp.transpose(h, (0, 3, 1, 2))


if __name__ == "__main__":
    key = jax.random.PRNGKey(0)
    kx, kp = jax.random.split(key)

    N, Cin, H, W = 2, 8, 16, 16          # first_head=True -> half=4, mid=8
    x = jax.random.normal(kx, (N, Cin, H, W), jnp.float32)

    params_kernel, params_hwio = make_params(kp, Cin, first_head=True)

    fwd = jax.jit(functools.partial(stack_to_head_pallas, params=params_kernel))
    out = fwd(x)
    out = jax.block_until_ready(out)

    ref = jax.block_until_ready(ref_forward(x, params_hwio))
    assert out.shape == ref.shape, (out.shape, ref.shape)
    assert jnp.allclose(out, ref, atol=2e-4, rtol=2e-4), float(jnp.max(jnp.abs(out - ref)))

    print("KERNEL_OK")
</pallas_src>

<mosaic_0001>
module attributes {stable_mosaic.version = 11 : i64} {
  func.func @_stack_to_head_kernel(%arg0: i32, %arg1: memref<1x8x256xf32, #tpu.memory_space<vmem>>, %arg2: memref<4x8xf32, #tpu.memory_space<vmem>>, %arg3: memref<4x1xf32, #tpu.memory_space<vmem>>, %arg4: memref<8x72xf32, #tpu.memory_space<vmem>>, %arg5: memref<8x1xf32, #tpu.memory_space<vmem>>, %arg6: memref<4x8xf32, #tpu.memory_space<vmem>>, %arg7: memref<4x1xf32, #tpu.memory_space<vmem>>, %arg8: memref<1x256xf32, #tpu.memory_space<vmem>>, %arg9: memref<1x256xf32, #tpu.memory_space<vmem>>, %arg10: memref<1x4x256xf32, #tpu.memory_space<vmem>>, %arg11: memref<4x512xf32, #tpu.memory_space<vmem>>, %arg12: memref<72x256xf32, #tpu.memory_space<vmem>>) attributes {dimension_semantics = [#tpu.dimension_semantics<parallel>], iteration_bounds = array<i64: 2>, scalar_prefetch = 0 : i64, scratch_operands = 2 : i64, tpu.core_type = #tpu.core_type<tc>, window_params = [{transform_indices = @transform_0, window_bounds = array<i64: 1, 8, 256>}, {pipeline_mode = #tpu.pipeline_mode<synchronous>, transform_indices = @transform_1, window_bounds = array<i64: 4, 8>}, {pipeline_mode = #tpu.pipeline_mode<synchronous>, transform_indices = @transform_2, window_bounds = array<i64: 4, 1>}, {pipeline_mode = #tpu.pipeline_mode<synchronous>, transform_indices = @transform_3, window_bounds = array<i64: 8, 72>}, {pipeline_mode = #tpu.pipeline_mode<synchronous>, transform_indices = @transform_4, window_bounds = array<i64: 8, 1>}, {pipeline_mode = #tpu.pipeline_mode<synchronous>, transform_indices = @transform_5, window_bounds = array<i64: 4, 8>}, {pipeline_mode = #tpu.pipeline_mode<synchronous>, transform_indices = @transform_6, window_bounds = array<i64: 4, 1>}, {pipeline_mode = #tpu.pipeline_mode<synchronous>, transform_indices = @transform_7, window_bounds = array<i64: 1, 256>}, {pipeline_mode = #tpu.pipeline_mode<synchronous>, transform_indices = @transform_8, window_bounds = array<i64: 1, 256>}, {transform_indices = @transform_9, window_bounds = array<i64: 1, 4, 256>}]} {
    %c0 = arith.constant 0 : index
    %c0_0 = arith.constant 0 : index
    %c0_1 = arith.constant 0 : index
    %0 = vector.load %arg1[%c0, %c0_0, %c0_1] : memref<1x8x256xf32, #tpu.memory_space<vmem>>, vector<1x8x256xf32>
    %1 = vector.shape_cast %0 : vector<1x8x256xf32> to vector<8x256xf32>
    %c0_2 = arith.constant 0 : index
    %c0_3 = arith.constant 0 : index
    %2 = vector.load %arg2[%c0_2, %c0_3] : memref<4x8xf32, #tpu.memory_space<vmem>>, vector<4x8xf32>
    %cst = arith.constant dense<0.000000e+00> : vector<4x256xf32>
    %3 = tpu.matmul %2, %1, %cst {dimension_numbers = #tpu.dot_dimension_numbers<[1], [0], [0], [1], [0, 0, 1, 1], [], []>} : vector<4x8xf32>, vector<8x256xf32>, vector<4x256xf32> -> vector<4x256xf32>
    %c0_4 = arith.constant 0 : index
    %c0_5 = arith.constant 0 : index
    %4 = vector.load %arg3[%c0_4, %c0_5] : memref<4x1xf32, #tpu.memory_space<vmem>>, vector<4x1xf32>
    %5 = vector.broadcast %4 : vector<4x1xf32> to vector<4x256xf32>
    %6 = arith.addf %3, %5 : vector<4x256xf32>
    %cst_6 = arith.constant 0.000000e+00 : f32
    %7 = vector.broadcast %cst_6 : f32 to vector<4x256xf32>
    %8 = arith.cmpf ogt, %6, %7 : vector<4x256xf32>
    %cst_7 = arith.constant 1.000000e-01 : f32
    %9 = vector.broadcast %cst_7 : f32 to vector<4x256xf32>
    %10 = arith.mulf %9, %6 : vector<4x256xf32>
    %11 = arith.select %8, %6, %10 : vector<4x256xi1>, vector<4x256xf32>
    %cst_8 = arith.constant 0.000000e+00 : f32
    %12 = vector.broadcast %cst_8 : f32 to vector<4x128xf32>
    %c0_9 = arith.constant 0 : index
    %c0_10 = arith.constant 0 : index
    %13 = vector.load %arg11[%c0_9, %c0_10] : memref<4x512xf32, #tpu.memory_space<vmem>>, vector<4x128xf32>
    tpu.vector_store %arg11[%c0_9, %c0_10], %12 {strides = array<i32>} : memref<4x512xf32, #tpu.memory_space<vmem>>, vector<4x128xf32>,
    %c0_11 = arith.constant 0 : index
    %c384 = arith.constant 384 : index
    %14 = vector.load %arg11[%c0_11, %c384] : memref<4x512xf32, #tpu.memory_space<vmem>>, vector<4x128xf32>
    tpu.vector_store %arg11[%c0_11, %c384], %12 {strides = array<i32>} : memref<4x512xf32, #tpu.memory_space<vmem>>, vector<4x128xf32>,
    %c0_12 = arith.constant 0 : index
    %c128 = arith.constant 128 : index
    %15 = vector.load %arg11[%c0_12, %c128] : memref<4x512xf32, #tpu.memory_space<vmem>>, vector<4x256xf32>
    tpu.vector_store %arg11[%c0_12, %c128], %11 {strides = array<i32>} : memref<4x512xf32, #tpu.memory_space<vmem>>, vector<4x256xf32>,
    %c0_13 = arith.constant 0 : index
    %c0_14 = arith.constant 0 : index
    %16 = vector.load %arg11[%c0_13, %c0_14] : memref<4x512xf32, #tpu.memory_space<vmem>>, vector<4x512xf32>
    %cst_15 = arith.constant 0.000000e+00 : f32
    %17 = vector.broadcast %cst_15 : f32 to vector<72x256xf32>
    %c0_16 = arith.constant 0 : index
    %c0_17 = arith.constant 0 : index
    %18 = vector.load %arg12[%c0_16, %c0_17] : memref<72x256xf32, #tpu.memory_space<vmem>>, vector<72x256xf32>
    tpu.vector_store %arg12[%c0_16, %c0_17], %17 {strides = array<i32>} : memref<72x256xf32, #tpu.memory_space<vmem>>, vector<72x256xf32>,
    %c0_18 = arith.constant 0 : index
    %c0_19 = arith.constant 0 : index
    %19 = vector.load %arg8[%c0_18, %c0_19] : memref<1x256xf32, #tpu.memory_space<vmem>>, vector<1x256xf32>
    %c0_20 = arith.constant 0 : index
    %c0_21 = arith.constant 0 : index
    %20 = vector.load %arg9[%c0_20, %c0_21] : memref<1x256xf32, #tpu.memory_space<vmem>>, vector<1x256xf32>
    %21 = vector.extract_strided_slice %16 {offsets = [0, 111], sizes = [4, 256], strides = [1, 1]} : vector<4x512xf32> to vector<4x256xf32>
    %22 = vector.broadcast %19 : vector<1x256xf32> to vector<4x256xf32>
    %23 = arith.mulf %21, %22 : vector<4x256xf32>
    %c0_22 = arith.constant 0 : index
    %c0_23 = arith.constant 0 : index
    %24 = vector.load %arg12[%c0_22, %c0_23] : memref<72x256xf32, #tpu.memory_space<vmem>>, vector<4x256xf32>
    tpu.vector_store %arg12[%c0_22, %c0_23], %23 {strides = array<i32>} : memref<72x256xf32, #tpu.memory_space<vmem>>, vector<4x256xf32>,
    %25 = vector.extract_strided_slice %16 {offsets = [0, 112], sizes = [4, 256], strides = [1, 1]} : vector<4x512xf32> to vector<4x256xf32>
    %c8 = arith.constant 8 : index
    %c0_24 = arith.constant 0 : index
    %26 = vector.load %arg12[%c8, %c0_24] : memref<72x256xf32, #tpu.memory_space<vmem>>, vector<4x256xf32>
    tpu.vector_store %arg12[%c8, %c0_24], %25 {strides = array<i32>} : memref<72x256xf32, #tpu.memory_space<vmem>>, vector<4x256xf32>,
    %27 = vector.extract_strided_slice %16 {offsets = [0, 113], sizes = [4, 256], strides = [1, 1]} : vector<4x512xf32> to vector<4x256xf32>
    %28 = vector.broadcast %20 : vector<1x256xf32> to vector<4x256xf32>
    %29 = arith.mulf %27, %28 : vector<4x256xf32>
    %c16 = arith.constant 16 : index
    %c0_25 = arith.constant 0 : index
    %30 = vector.load %arg12[%c16, %c0_25] : memref<72x256xf32, #tpu.memory_space<vmem>>, vector<4x256xf32>
    tpu.vector_store %arg12[%c16, %c0_25], %29 {strides = array<i32>} : memref<72x256xf32, #tpu.memory_space<vmem>>, vector<4x256xf32>,
    %31 = vector.extract_strided_slice %16 {offsets = [0, 127], sizes = [4, 256], strides = [1, 1]} : vector<4x512xf32> to vector<4x256xf32>
    %32 = vector.broadcast %19 : vector<1x256xf32> to vector<4x256xf32>
    %33 = arith.mulf %31, %32 : vector<4x256xf32>
    %c24 = arith.constant 24 : index
    %c0_26 = arith.constant 0 : index
    %34 = vector.load %arg12[%c24, %c0_26] : memref<72x256xf32, #tpu.memory_space<vmem>>, vector<4x256xf32>
    tpu.vector_store %arg12[%c24, %c0_26], %33 {strides = array<i32>} : memref<72x256xf32, #tpu.memory_space<vmem>>, vector<4x256xf32>,
    %35 = vector.extract_strided_slice %16 {offsets = [0, 128], sizes = [4, 256], strides = [1, 1]} : vector<4x512xf32> to vector<4x256xf32>
    %c32 = arith.constant 32 : index
    %c0_27 = arith.constant 0 : index
    %36 = vector.load %arg12[%c32, %c0_27] : memref<72x256xf32, #tpu.memory_space<vmem>>, vector<4x256xf32>
    tpu.vector_store %arg12[%c32, %c0_27], %35 {strides = array<i32>} : memref<72x256xf32, #tpu.memory_space<vmem>>, vector<4x256xf32>,
    %37 = vector.extract_strided_slice %16 {offsets = [0, 129], sizes = [4, 256], strides = [1, 1]} : vector<4x512xf32> to vector<4x256xf32>
    %38 = vector.broadcast %20 : vector<1x256xf32> to vector<4x256xf32>
    %39 = arith.mulf %37, %38 : vector<4x256xf32>
    %c40 = arith.constant 40 : index
    %c0_28 = arith.constant 0 : index
    %40 = vector.load %arg12[%c40, %c0_28] : memref<72x256xf32, #tpu.memory_space<vmem>>, vector<4x256xf32>
    tpu.vector_store %arg12[%c40, %c0_28], %39 {strides = array<i32>} : memref<72x256xf32, #tpu.memory_space<vmem>>, vector<4x256xf32>,
    %41 = vector.extract_strided_slice %16 {offsets = [0, 143], sizes = [4, 256], strides = [1, 1]} : vector<4x512xf32> to vector<4x256xf32>
    %42 = vector.broadcast %19 : vector<1x256xf32> to vector<4x256xf32>
    %43 = arith.mulf %41, %42 : vector<4x256xf32>
    %c48 = arith.constant 48 : index
    %c0_29 = arith.constant 0 : index
    %44 = vector.load %arg12[%c48, %c0_29] : memref<72x256xf32, #tpu.memory_space<vmem>>, vector<4x256xf32>
    tpu.vector_store %arg12[%c48, %c0_29], %43 {strides = array<i32>} : memref<72x256xf32, #tpu.memory_space<vmem>>, vector<4x256xf32>,
    %45 = vector.extract_strided_slice %16 {offsets = [0, 144], sizes = [4, 256], strides = [1, 1]} : vector<4x512xf32> to vector<4x256xf32>
    %c56 = arith.constant 56 : index
    %c0_30 = arith.constant 0 : index
    %46 = vector.load %arg12[%c56, %c0_30] : memref<72x256xf32, #tpu.memory_space<vmem>>, vector<4x256xf32>
    tpu.vector_store %arg12[%c56, %c0_30], %45 {strides = array<i32>} : memref<72x256xf32, #tpu.memory_space<vmem>>, vector<4x256xf32>,
    %47 = vector.extract_strided_slice %16 {offsets = [0, 145], sizes = [4, 256], strides = [1, 1]} : vector<4x512xf32> to vector<4x256xf32>
    %48 = vector.broadcast %20 : vector<1x256xf32> to vector<4x256xf32>
    %49 = arith.mulf %47, %48 : vector<4x256xf32>
    %c64 = arith.constant 64 : index
    %c0_31 = arith.constant 0 : index
    %50 = vector.load %arg12[%c64, %c0_31] : memref<72x256xf32, #tpu.memory_space<vmem>>, vector<4x256xf32>
    tpu.vector_store %arg12[%c64, %c0_31], %49 {strides = array<i32>} : memref<72x256xf32, #tpu.memory_space<vmem>>, vector<4x256xf32>,
    %c0_32 = arith.constant 0 : index
    %c0_33 = arith.constant 0 : index
    %51 = vector.load %arg4[%c0_32, %c0_33] : memref<8x72xf32, #tpu.memory_space<vmem>>, vector<8x72xf32>
    %c0_34 = arith.constant 0 : index
    %c0_35 = arith.constant 0 : index
    %52 = vector.load %arg12[%c0_34, %c0_35] : memref<72x256xf32, #tpu.memory_space<vmem>>, vector<72x256xf32>
    %cst_36 = arith.constant dense<0.000000e+00> : vector<8x256xf32>
    %53 = tpu.matmul %51, %52, %cst_36 {dimension_numbers = #tpu.dot_dimension_numbers<[1], [0], [0], [1], [0, 0, 1, 1], [], []>} : vector<8x72xf32>, vector<72x256xf32>, vector<8x256xf32> -> vector<8x256xf32>
    %c0_37 = arith.constant 0 : index
    %c0_38 = arith.constant 0 : index
    %54 = vector.load %arg5[%c0_37, %c0_38] : memref<8x1xf32, #tpu.memory_space<vmem>>, vector<8x1xf32>
    %55 = vector.broadcast %54 : vector<8x1xf32> to vector<8x256xf32>
    %56 = arith.addf %53, %55 : vector<8x256xf32>
    %cst_39 = arith.constant 0.000000e+00 : f32
    %57 = vector.broadcast %cst_39 : f32 to vector<8x256xf32>
    %58 = arith.cmpf ogt, %56, %57 : vector<8x256xf32>
    %cst_40 = arith.constant 1.000000e-01 : f32
    %59 = vector.broadcast %cst_40 : f32 to vector<8x256xf32>
    %60 = arith.mulf %59, %56 : vector<8x256xf32>
    %61 = arith.select %58, %56, %60 : vector<8x256xi1>, vector<8x256xf32>
    %c0_41 = arith.constant 0 : index
    %c0_42 = arith.constant 0 : index
    %62 = vector.load %arg6[%c0_41, %c0_42] : memref<4x8xf32, #tpu.memory_space<vmem>>, vector<4x8xf32>
    %cst_43 = arith.constant dense<0.000000e+00> : vector<4x256xf32>
    %63 = tpu.matmul %62, %61, %cst_43 {dimension_numbers = #tpu.dot_dimension_numbers<[1], [0], [0], [1], [0, 0, 1, 1], [], []>} : vector<4x8xf32>, vector<8x256xf32>, vector<4x256xf32> -> vector<4x256xf32>
    %c0_44 = arith.constant 0 : index
    %c0_45 = arith.constant 0 : index
    %64 = vector.load %arg7[%c0_44, %c0_45] : memref<4x1xf32, #tpu.memory_space<vmem>>, vector<4x1xf32>
    %65 = vector.broadcast %64 : vector<4x1xf32> to vector<4x256xf32>
    %66 = arith.addf %63, %65 : vector<4x256xf32>
    %cst_46 = arith.constant 0.000000e+00 : f32
    %67 = vector.broadcast %cst_46 : f32 to vector<4x256xf32>
    %68 = arith.cmpf ogt, %66, %67 : vector<4x256xf32>
    %cst_47 = arith.constant 1.000000e-01 : f32
    %69 = vector.broadcast %cst_47 : f32 to vector<4x256xf32>
    %70 = arith.mulf %69, %66 : vector<4x256xf32>
    %71 = arith.select %68, %66, %70 : vector<4x256xi1>, vector<4x256xf32>
    %c0_48 = arith.constant 0 : index
    %c0_49 = arith.constant 0 : index
    %c0_50 = arith.constant 0 : index
    %72 = vector.load %arg10[%c0_48, %c0_49, %c0_50] : memref<1x4x256xf32, #tpu.memory_space<vmem>>, vector<1x4x256xf32>
    %73 = vector.shape_cast %72 : vector<1x4x256xf32> to vector<4x256xf32>
    %74 = vector.shape_cast %71 : vector<4x256xf32> to vector<1x4x256xf32>
    tpu.vector_store %arg10[%c0_48, %c0_49, %c0_50], %74 {strides = array<i32>} : memref<1x4x256xf32, #tpu.memory_space<vmem>>, vector<1x4x256xf32>,
    return
  }
  func.func @transform_0(%arg0: i32) -> (i32, i32, i32) {
    %c0_i32 = arith.constant 0 : i32
    %c0_i32_0 = arith.constant 0 : i32
    %c0_i32_1 = arith.constant 0 : i32
    return %arg0, %c0_i32, %c0_i32_0 : i32, i32, i32
  }
  func.func @transform_1(%arg0: i32) -> (i32, i32) {
    %c0_i32 = arith.constant 0 : i32
    %c0_i32_0 = arith.constant 0 : i32
    %c0_i32_1 = arith.constant 0 : i32
    return %c0_i32, %c0_i32_0 : i32, i32
  }
  func.func @transform_2(%arg0: i32) -> (i32, i32) {
    %c0_i32 = arith.constant 0 : i32
    %c0_i32_0 = arith.constant 0 : i32
    %c0_i32_1 = arith.constant 0 : i32
    return %c0_i32, %c0_i32_0 : i32, i32
  }
  func.func @transform_3(%arg0: i32) -> (i32, i32) {
    %c0_i32 = arith.constant 0 : i32
    %c0_i32_0 = arith.constant 0 : i32
    %c0_i32_1 = arith.constant 0 : i32
    return %c0_i32, %c0_i32_0 : i32, i32
  }
  func.func @transform_4(%arg0: i32) -> (i32, i32) {
    %c0_i32 = arith.constant 0 : i32
    %c0_i32_0 = arith.constant 0 : i32
    %c0_i32_1 = arith.constant 0 : i32
    return %c0_i32, %c0_i32_0 : i32, i32
  }
  func.func @transform_5(%arg0: i32) -> (i32, i32) {
    %c0_i32 = arith.constant 0 : i32
    %c0_i32_0 = arith.constant 0 : i32
    %c0_i32_1 = arith.constant 0 : i32
    return %c0_i32, %c0_i32_0 : i32, i32
  }
  func.func @transform_6(%arg0: i32) -> (i32, i32) {
    %c0_i32 = arith.constant 0 : i32
    %c0_i32_0 = arith.constant 0 : i32
    %c0_i32_1 = arith.constant 0 : i32
    return %c0_i32, %c0_i32_0 : i32, i32
  }
  func.func @transform_7(%arg0: i32) -> (i32, i32) {
    %c0_i32 = arith.constant 0 : i32
    %c0_i32_0 = arith.constant 0 : i32
    %c0_i32_1 = arith.constant 0 : i32
    return %c0_i32, %c0_i32_0 : i32, i32
  }
  func.func @transform_8(%arg0: i32) -> (i32, i32) {
    %c0_i32 = arith.constant 0 : i32
    %c0_i32_0 = arith.constant 0 : i32
    %c0_i32_1 = arith.constant 0 : i32
    return %c0_i32, %c0_i32_0 : i32, i32
  }
  func.func @transform_9(%arg0: i32) -> (i32, i32, i32) {
    %c0_i32 = arith.constant 0 : i32
    %c0_i32_0 = arith.constant 0 : i32
    %c0_i32_1 = arith.constant 0 : i32
    return %arg0, %c0_i32, %c0_i32_0 : i32, i32, i32
  }
}

</mosaic_0001>

<bundles_post_ra>
// kernel: stack_to_head_pallas.1
= control target key start
LH: loop header
LB: loop body
LE: loop exit
PB: predicated region body
PF: predicated region fallthrough
CT: control target
= control target key end

     0   :  { %s1003_s30 = smov 0   ;;  %s1090_s0 = inlined_call_operand.vmem [shape: f32[2,8,256], index: 0, kind: input, shape index: {}]   ;;  %s1091_s1 = inlined_call_operand.vmem [shape: f32[4,8], index: 1, kind: input, shape index: {}]   ;;  %s1092_s2 = inlined_call_operand.vmem [shape: f32[4,1], index: 2, kind: input, shape index: {}]   ;;  %s1093_s3 = inlined_call_operand.vmem [shape: f32[8,72], index: 3, kind: input, shape index: {}]   ;;  %s1094_s4 = inlined_call_operand.vmem [shape: f32[8,1], index: 4, kind: input, shape index: {}]   ;;  %s1095_s5 = inlined_call_operand.vmem [shape: f32[4,8], index: 5, kind: input, shape index: {}]   ;;  %s1096_s6 = inlined_call_operand.vmem [shape: f32[4,1], index: 6, kind: input, shape index: {}]   ;;  %s1097_s7 = inlined_call_operand.vmem [shape: f32[1,256], index: 7, kind: input, shape index: {}]   ;;  %s1098_s8 = inlined_call_operand.vmem [shape: f32[1,256], index: 8, kind: input, shape index: {}]   ;;  %s1099_s9 = inlined_call_operand.vmem [shape: f32[2,4,256], index: 9, kind: output, shape index: {}]  }
   0x1 LB: > { %s881_s10 = sadd.s32 4294967295, %s941_s30   ;;  %p885_p0 = scmp.ge.s32.totalorder %s941_s30, 1  ;;  %s941_s30 = sphi %s1003_s30, %s19_s30  }
   0x2   : > { %p287_p1 = scmp.lt.s32.totalorder %s941_s30, 3 }
   0x4   : > { %p288_p2 = pnand %p885_p0, %p287_p1 }
   0x5   : > { %p1013_p3 = scmp.lt.s32.totalorder (!%p288_p2), %s881_s10, 1  ;;  %v453_v0 = vlaneseq (!%p288_p2)  ;;  %v943_v1 = vmov (!%p288_p2), 0.0   ;;  %v944_v2 = vmov (!%p288_p2), 0   ;;  %v336_v3 = vld [vmem:[%s1092_s2] sm:$0xf] (!%p288_p2)  ;;  %vm342_vm0 = vcmask (!%p288_p2), 64512  }
   0x6   : > { %291 = sbr.rel (%p288_p2) target bundleno = 859 (0x35b), region = 56  ;;  %410 = vmatprep.mubr.f32.mxu0 (!%p288_p2), %v943_v1  ;;  %423 = vst [vmem:[#allocation2] sm:$0xf] (!%p288_p2), %v943_v1  ;;  %424 = vst [vmem:[#allocation2 + $0xc] sm:$0xf] (!%p288_p2), %v943_v1  ;;  %931 = vset.pattern.permute.xlu0 (!%p288_p2), %v944_v2  ;;  %s945_s24 = smov (!%p288_p2), 113  }
   0x7   : > { %432 = vst [vmem:[#allocation3] sm:$0xff] (!%p288_p2), %v943_v1  ;;  %433 = vst [vmem:[#allocation3 + $0x8] sm:$0xff] (!%p288_p2), %v943_v1  ;;  %339 = vperm.xlu0 (!%p288_p2), %931, %v336_v3   ;;  %v454_v4 = vshrl.u32 (!%p288_p2), %v453_v0, 7  ;;  %721 = vmatprep.mubr.f32.mxu1 (!%p288_p2), %v943_v1  ;;  %v451_v5 = vld [vmem:[%s1098_s8] sm:$0x3] (!%p288_p2)  ;;  %s946_s25 = smov (!%p288_p2), 111  }
   0x8   : > { %434 = vst [vmem:[#allocation3 + $0x10] sm:$0xff] (!%p288_p2), %v943_v1  ;;  %435 = vst [vmem:[#allocation3 + $0x18] sm:$0xff] (!%p288_p2), %v943_v1  ;;  %v450_v6 = vld [vmem:[%s1097_s7] sm:$0x3] (!%p288_p2)  ;;  %932 = vset.pattern.permute.xlu1 (!%p288_p2), %v944_v2  ;;  %s947_s26 = smov (!%p288_p2), 127   ;;  %s948_s27 = smov (!%p288_p2), 16  }
   0x9   : > { %436 = vst [vmem:[#allocation3 + $0x20] sm:$0xff] (!%p288_p2), %v943_v1  ;;  %437 = vst [vmem:[#allocation3 + $0x28] sm:$0xff] (!%p288_p2), %v943_v1  ;;  %v455_v7 = vsub.s32 (!%p288_p2), 0, %v454_v4  ;;  %v459_v8 = vsub.s32 (!%p288_p2), 1, %v454_v4  ;;  %v335_v11 = vld [vmem:[%s1091_s1] sm:$0xf] (!%p288_p2) }
   0xa   : > { %438 = vst [vmem:[#allocation3 + $0x30] sm:$0xff] (!%p288_p2), %v943_v1  ;;  %439 = vst [vmem:[#allocation3 + $0x38] sm:$0xff] (!%p288_p2), %v943_v1  ;;  %vm465_vm3 = vcmask (!%p288_p2), 908288   ;;  %vm516_vm4 = vcmask (!%p288_p2), 924672   ;;  %s949_s28 = smov (!%p288_p2), 17   ;;  %vm541_vm5 = vcmask (!%p288_p2), 1039360  }
   0xb   : > { %440 = vst [vmem:[#allocation3 + $0x40] sm:$0xff] (!%p288_p2), %v943_v1  ;;  %441 = vst [vmem:[#allocation3 + $0x48] sm:$0xff] (!%p288_p2), %v943_v1  ;;  %v507_v12 = vrot.slane (!%p288_p2), %v451_v5, %v455_v7  ;;  %v511_v13 = vrot.slane (!%p288_p2), %v451_v5, %v459_v8  ;;  %v456_v14 = vrot.slane (!%p288_p2), %v450_v6, %v455_v7  ;;  %s950_s29 = smov (!%p288_p2), 15   ;;  %s951_s11 = smov (!%p288_p2), 1   ;;  %v735_v50 = vld [vmem:[%s1096_s6] sm:$0xf] (!%p288_p2) }
   0xc   : > { %442 = vst [vmem:[#allocation3 + $0x50] sm:$0xff] (!%p288_p2), %v943_v1  ;;  %443 = vst [vmem:[#allocation3 + $0x58] sm:$0xff] (!%p288_p2), %v943_v1  ;;  %v460_v15 = vrot.slane (!%p288_p2), %v450_v6, %v459_v8  ;;  %s952_s12 = smov (!%p288_p2), 112   ;;  %v647_v51 = vld [vmem:[%s1094_s4] sm:$0xff] (!%p288_p2)  ;;  %vm496_vm6 = vcmask (!%p288_p2), 130048   ;;  %vm572_vm7 = vcmask (!%p288_p2), 1043456  }
   0xd   : > { %444 = vst [vmem:[#allocation3 + $0x60] sm:$0xff] %v943_v1  ;;  %445 = vst [vmem:[#allocation3 + $0x68] sm:$0xff] %v943_v1  ;;  %s1102_s10 = smov (!%p1013_p3, %s881_s10), 1  ;;  %v1039_v16 = vcombine.low %v507_v12, %v511_v13  ;;  %vm480_vm8 = vcmask 138240   ;;  %vm531_vm9 = vcmask 121856   ;;  %vm556_vm10 = vcmask 7168  }
   0xe   : > { %446 = vst [vmem:[#allocation3 + $0x70] sm:$0xff] %v943_v1  ;;  %447 = vst [vmem:[#allocation3 + $0x78] sm:$0xff] %v943_v1  ;;  %s895_s18 = sshll.u32 %s1102_s10, 4  ;;  %v1041_v17 = vcombine.low %v456_v14, %v460_v15  ;;  %vm606_vm11 = vcmask 916480   ;;  %vm653_vm12 = vcmask 588800  }
   0xf   : > { %448 = vst [vmem:[#allocation3 + $0x80] sm:$0xff] %v943_v1  ;;  %449 = vst [vmem:[#allocation3 + $0x88] sm:$0xff] %v943_v1  ;;  %s327_s21 = scalar_lea.vmem %s1090_s0, %s895_s18  ;;  %513 = vrot.lane.b32.xlu1 %v1039_v16, %s945_s24 }
  0x10   : > { %v334_v9 = vld [vmem:[%s327_s21 + $0x8] sm:$0xff]  ;;  %v333_v10 = vld [vmem:[%s327_s21] sm:$0xff]  ;;  %462 = vrot.lane.b32.xlu0 %v1041_v17, %s946_s25  ;;  %s896_s21 = sshll.u32 %s1102_s10, 3 }
  0x11   : > { %346 = vmatprep.subr.mxu0 %v334_v9 }
  0x12   : > { %347 = vmatpush1.msra.mxu0 %v333_v10 }
  0x13   : > { %890 = vmatmul.mubr.msk.f32.vlgmr.msra.gmra.mrb[0].mxu0 %vm342_vm0, %v335_v11  ;;  %538 = vrot.lane.b32.xlu1 %v1041_v17, %s947_s26 }
  0x14   : > { %808 = vmatprep.mubr.f32.mxu0 %v943_v1 }
  0x81   : > { %v514_v33 = vpop.permute.xlu1 %513 }
  0x82   : > { %v515_v34 = vrot.slane %v514_v33, 4 }
  0x84   : > { %v517_v37 = vsel %vm516_vm4, %v515_v34, %v514_v33 }
  0x85   : > { %v539_v38 = vpop.permute.xlu1 %538 }
  0x86   : > { %v340_v18 = vpop.permute.xlu0 %339  ;;  %v540_v41 = vrot.slane %v539_v38, 4 }
  0x88   : > { %v542_v44 = vsel %vm541_vm5, %v540_v41, %v539_v38 }
  0x8a   : > { %v463_v30 = vpop.permute.xlu0 %462 }
  0x8b   : > { %v464_v32 = vrot.slane %v463_v30, 4 }
  0x8d   : > { %v466_v35 = vsel %vm465_vm3, %v464_v32, %v463_v30 }
  0xe6   : > { %v412_v19 = vpop.f32.mrb[0].mxu0 }
  0xe7   : > { %v413_v20 = vadd.f32 %v412_v19, %v340_v18  ;;  %v414_v21 = vpop.f32.mrb[1].mxu0 }
  0xe8   : > { %v415_v22 = vadd.f32 %v414_v21, %v340_v18 }
  0xe9   : > { %vm417_vm1 = vcmp.gt.f32.partialorder %v413_v20, 0.0  ;;  %v419_v23 = vmul.f32 0.1, %v413_v20 }
  0xea   : > { %vm418_vm2 = vcmp.gt.f32.partialorder %v415_v22, 0.0  ;;  %v420_v24 = vmul.f32 0.1, %v415_v22 }
  0xeb   : > { %v421_v25 = vsel %vm417_vm1, %v413_v20, %v419_v23 }
  0xec   : > { %v422_v26 = vsel %vm418_vm2, %v415_v22, %v420_v24 }
  0xed   : > { %v427_v27 = vcombine.low %v421_v25, %v422_v26 }
  0xef   : > { %429 = vst [vmem:[#allocation2 + $0x4] sm:$0xff] %v427_v27 }
  0xf6   : > { %v430_v28 = vld [vmem:[#allocation2] sm:$0xff]  ;;  %v431_v29 = vld [vmem:[#allocation2 + $0x8] sm:$0xff] }
  0xf7   : > { %565 = vst [vmem:[#allocation3 + $0x48] sm:$0xf] %v431_v29  ;;  %494 = vrot.lane.b32.xlu1 %v431_v29, %s948_s27  ;;  %566 = vrot.lane.b32.xlu0 %v430_v28, %s947_s26  ;;  %v489_v31 = vcombine.high %v430_v28, %v430_v28  ;;  %v469_v36 = vmul.f32 %v466_v35, %v430_v28 }
  0xf8   : > { %v470_v39 = vmul.f32 %v464_v32, %v431_v29  ;;  %v520_v40 = vmul.f32 %v517_v37, %v430_v28  ;;  %v521_v42 = vmul.f32 %v515_v34, %v431_v29  ;;  %v546_v45 = vmul.f32 %v540_v41, %v431_v29 }
  0xf9   : > { %564 = vst [vmem:[#allocation3 + $0x40] sm:$0xf] %v489_v31  ;;  %v473_v43 = vcombine.high %v469_v36, %v469_v36  ;;  %v545_v46 = vmul.f32 %v542_v44, %v430_v28  ;;  %v599_v49 = vcombine.high %v431_v29, %v431_v29 }
  0xfa   : > { %v524_v47 = vcombine.high %v520_v40, %v520_v40 }
  0xfb   : > { %490 = vrot.lane.b32.xlu1 %v430_v28, %s948_s27  ;;  %583 = vrot.lane.b32.xlu0 %v430_v28, %s945_s24  ;;  %v549_v48 = vcombine.high %v545_v46, %v545_v46 }
  0xff   : > { %568 = vrot.lane.b32.xlu1 %v431_v29, %s947_s26  ;;  %492 = vrot.lane.b32.xlu0 %v489_v31, %s948_s27 }
 0x103   : > { %585 = vrot.lane.b32.xlu1 %v431_v29, %s945_s24  ;;  %474 = vrot.lane.b32.xlu0 %v469_v36, %s949_s28  ;;  %s332_s24 = scalar_lea.vmem %s1099_s9, %s896_s21 }
 0x107   : > { %478 = vrot.lane.b32.xlu1 %v470_v39, %s949_s28  ;;  %525 = vrot.lane.b32.xlu0 %v520_v40, %s950_s29 }
 0x10b   : > { %529 = vrot.lane.b32.xlu1 %v521_v42, %s950_s29  ;;  %476 = vrot.lane.b32.xlu0 %v473_v43, %s949_s28 }
 0x10f   : > { %554 = vrot.lane.b32.xlu1 %v546_v45, %s951_s11  ;;  %527 = vrot.lane.b32.xlu0 %v524_v47, %s950_s29 }
 0x113   : > { %550 = vrot.lane.b32.xlu1 %v545_v46, %s951_s11  ;;  %552 = vrot.lane.b32.xlu0 %v549_v48, %s951_s11 }
 0x117   : > { %615 = vrot.lane.b32.xlu1 %v431_v29, %s946_s25  ;;  %613 = vrot.lane.b32.xlu0 %v430_v28, %s946_s25 }
 0x11b   : > { %604 = vrot.lane.b32.xlu1 %v599_v49, %s952_s12  ;;  %602 = vrot.lane.b32.xlu0 %v431_v29, %s952_s12  ;;  %v638_v49 = vld [vmem:[#allocation3 + $0x48] sm:$0xff] }
 0x11f   : > { %600 = vrot.lane.b32.xlu0 %v489_v31, %s952_s12  ;;  %650 = vperm.xlu1 %932, %v647_v51  }
 0x123   : > { %738 = vperm.xlu0 %931, %v735_v50  }
 0x169   : > { %v495_v52 = vpop.permute.xlu1 %494  ;;  %v567_v53 = vpop.permute.xlu0 %566 }
 0x16a   : > { %v570_v57 = vrot.slane %v567_v53, 4 }
 0x16d   : > { %v491_v54 = vpop.permute.xlu1 %490  ;;  %v584_v55 = vpop.permute.xlu0 %583 }
 0x16e   : > { %v587_v1 = vrot.slane %v584_v55, 4 }
 0x171   : > { %v569_v56 = vpop.permute.xlu1 %568  ;;  %v493_v59 = vpop.permute.xlu0 %492 }
 0x172   : > { %v571_v58 = vrot.slane %v569_v56, 4  ;;  %v497_v60 = vsel %vm496_vm6, %v491_v54, %v493_v59  ;;  %v498_v61 = vsel %vm496_vm6, %v493_v59, %v495_v52 }
 0x173   : > { %501 = vst [vmem:[#allocation3 + $0x10] sm:$0xf] %v497_v60  ;;  %502 = vst [vmem:[#allocation3 + $0x18] sm:$0xf] %v498_v61 }
 0x174   : > { %v573_v62 = vsel %vm572_vm7, %v570_v57, %v571_v58 }
 0x175   : > { %v574_v63 = vsel %vm541_vm5, %v573_v62, %v569_v56  ;;  %v586_v0 = vpop.permute.xlu1 %585  ;;  %v475_v4 = vpop.permute.xlu0 %474  ;;  %v628_v62 = vld [vmem:[%s1093_s3] sm:$0xff] }
 0x176   : > { %v577_v2 = vmul.f32 %v574_v63, %v1039_v16  ;;  %v588_v3 = vrot.slane %v586_v0, 4 }
 0x178   : > { %v579_v5 = vcombine.high %v577_v2, %v577_v2  ;;  %581 = vst [vmem:[#allocation3 + $0x50] sm:$0xf] %v577_v2  ;;  %v589_v6 = vsel %vm572_vm7, %v587_v1, %v588_v3 }
 0x179   : > { %v590_v7 = vsel %vm516_vm4, %v589_v6, %v586_v0  ;;  %v479_v8 = vpop.permute.xlu1 %478  ;;  %v526_v10 = vpop.permute.xlu0 %525 }
 0x17a   : > { %582 = vst [vmem:[#allocation3 + $0x58] sm:$0xf] %v579_v5  ;;  %v593_v9 = vmul.f32 %v590_v7, %v1041_v17  ;;  %v632_v23 = vld [vmem:[#allocation3 + $0x18] sm:$0xff]  ;;  %v631_v28 = vld [vmem:[#allocation3 + $0x10] sm:$0xff] }
 0x17c   : > { %v595_v11 = vcombine.high %v593_v9, %v593_v9  ;;  %597 = vst [vmem:[#allocation3 + $0x60] sm:$0xf] %v593_v9 }
 0x17d   : > { %v530_v12 = vpop.permute.xlu1 %529  ;;  %v477_v13 = vpop.permute.xlu0 %476 }
 0x17e   : > { %598 = vst [vmem:[#allocation3 + $0x68] sm:$0xf] %v595_v11  ;;  %v481_v14 = vsel %vm480_vm8, %v475_v4, %v477_v13  ;;  %v482_v15 = vsel %vm480_vm8, %v477_v13, %v479_v8  ;;  %v734_v8 = vld [vmem:[%s1095_s5] sm:$0xf] }
 0x17f   : > { %485 = vst [vmem:[#allocation3] sm:$0xf] %v481_v14  ;;  %486 = vst [vmem:[#allocation3 + $0x8] sm:$0xf] %v482_v15  ;;  %v639_v52 = vld [vmem:[#allocation3 + $0x50] sm:$0xff] }
 0x181   : > { %v555_v18 = vpop.permute.xlu1 %554  ;;  %v528_v19 = vpop.permute.xlu0 %527  ;;  %v640_v40 = vld [vmem:[#allocation3 + $0x58] sm:$0xff] }
 0x182   : > { %v532_v20 = vsel %vm531_vm9, %v526_v10, %v528_v19  ;;  %v533_v21 = vsel %vm531_vm9, %v528_v19, %v530_v12  ;;  %v905_v51 = vpack.c.bf16 %v640_v40, %v638_v49 }
 0x183   : > { %536 = vst [vmem:[#allocation3 + $0x20] sm:$0xf] %v532_v20  ;;  %537 = vst [vmem:[#allocation3 + $0x28] sm:$0xf] %v533_v21  ;;  %v641_v58 = vld [vmem:[#allocation3 + $0x60] sm:$0xff] }
 0x185   : > { %v551_v17 = vpop.permute.xlu1 %550  ;;  %v553_v22 = vpop.permute.xlu0 %552  ;;  %v642_v55 = vld [vmem:[#allocation3 + $0x68] sm:$0xff] }
 0x186   : > { %v557_v24 = vsel %vm556_vm10, %v551_v17, %v553_v22  ;;  %v558_v25 = vsel %vm556_vm10, %v553_v22, %v555_v18  ;;  %v630_v26 = vld [vmem:[#allocation3 + $0x8] sm:$0xff]  ;;  %v629_v27 = vld [vmem:[#allocation3] sm:$0xff] }
 0x187   : > { %561 = vst [vmem:[#allocation3 + $0x30] sm:$0xf] %v557_v24  ;;  %562 = vst [vmem:[#allocation3 + $0x38] sm:$0xf] %v558_v25  ;;  %v897_v29 = vpack.c.bf16 %v632_v23, %v630_v26  ;;  %v899_v30 = vpack.c.bf16 %v631_v28, %v629_v27 }
 0x189   : > { %v616_v31 = vpop.permute.xlu1 %615  ;;  %898 = vmatprep.subr.bf16.mxu1 %v897_v29  ;;  %v614_v33 = vpop.permute.xlu0 %613 }
 0x18a   : > { %v618_v32 = vrot.slane %v616_v31, 4  ;;  %v617_v34 = vrot.slane %v614_v33, 4  ;;  %900 = vmatpush1.bf16.msra.mxu1 %v899_v30  ;;  %v634_v39 = vld [vmem:[#allocation3 + $0x28] sm:$0xff]  ;;  %v633_v44 = vld [vmem:[#allocation3 + $0x20] sm:$0xff] }
 0x18c   : > { %v619_v35 = vsel %vm572_vm7, %v617_v34, %v618_v32 }
 0x18d   : > { %v605_v36 = vpop.permute.xlu1 %604  ;;  %v620_v37 = vsel %vm465_vm3, %v619_v35, %v616_v31  ;;  %v603_v38 = vpop.permute.xlu0 %602 }
 0x18e   : > { %v622_v41 = vmul.f32 %v620_v37, %v1039_v16  ;;  %v608_v42 = vsel %vm606_vm11, %v603_v38, %v605_v36  ;;  %v636_v43 = vld [vmem:[#allocation3 + $0x38] sm:$0xff]  ;;  %v635_v45 = vld [vmem:[#allocation3 + $0x30] sm:$0xff]  ;;  %v637_v16 = vld [vmem:[#allocation3 + $0x40] sm:$0xff] }
 0x18f   : > { %612 = vst [vmem:[#allocation3 + $0x78] sm:$0xf] %v608_v42  ;;  %v901_v46 = vpack.c.bf16 %v636_v43, %v634_v39  ;;  %v903_v47 = vpack.c.bf16 %v635_v45, %v633_v44  ;;  %v907_v54 = vpack.c.bf16 %v639_v52, %v637_v16 }
 0x190   : > { %v624_v48 = vcombine.high %v622_v41, %v622_v41  ;;  %626 = vst [vmem:[#allocation3 + $0x80] sm:$0xf] %v622_v41 }
 0x191   : > { %902 = vmatprep.subr.bf16.mxu1 %v901_v46  ;;  %v601_v50 = vpop.permute.xlu0 %600 }
 0x192   : > { %627 = vst [vmem:[#allocation3 + $0x88] sm:$0xf] %v624_v48  ;;  %v607_v53 = vsel %vm606_vm11, %v601_v50, %v603_v38  ;;  %904 = vmatpush1.bf16.msra.mxu1 %v903_v47 }
 0x193   : > { %611 = vst [vmem:[#allocation3 + $0x70] sm:$0xf] %v607_v53  ;;  %906 = vmatprep.subr.bf16.mxu1 %v905_v51 }
 0x196   : > { %908 = vmatpush1.bf16.msra.mxu1 %v907_v54  ;;  %v644_v56 = vld [vmem:[#allocation3 + $0x78] sm:$0xff] }
 0x197   : > { %v909_v57 = vpack.c.bf16 %v644_v56, %v642_v55  ;;  %v645_v63 = vld [vmem:[#allocation3 + $0x80] sm:$0xff] }
 0x199   : > { %910 = vmatprep.subr.bf16.mxu1 %v909_v57  ;;  %v646_v61 = vld [vmem:[#allocation3 + $0x88] sm:$0xff] }
 0x19a   : > { %v643_v59 = vld [vmem:[#allocation3 + $0x70] sm:$0xff] }
 0x19b   : > { %v911_v60 = vpack.c.bf16 %v643_v59, %v641_v58 }
 0x19d   : > { %912 = vmatpush1.bf16.msra.mxu1 %v911_v60 }
 0x19e   : > { %673 = vmatprep.subr.mxu1 %v646_v61  ;;  %v651_v0 = vpop.permute.xlu1 %650 }
 0x1a1   : > { %674 = vmatpush1.msra.mxu1 %v645_v63 }
 0x1a2   : > { %891 = vmatmul.mubr.msk.f32.vlgmr.msra.gmra.mrb[0].mxu1 %vm653_vm12, %v628_v62  ;;  %v739_v10 = vpop.permute.xlu0 %738 }
 0x275   : > { %v723_v1 = vpop.f32.mrb[0].mxu1 }
 0x276   : > { %v724_v2 = vadd.f32 %v723_v1, %v651_v0  ;;  %v725_v3 = vpop.f32.mrb[1].mxu1 }
 0x277   : > { %v726_v4 = vadd.f32 %v725_v3, %v651_v0 }
 0x278   : > { %v730_v5 = vmul.f32 0.1, %v724_v2  ;;  %vm728_vm13 = vcmp.gt.f32.partialorder %v724_v2, 0.0 }
 0x279   : > { %v731_v6 = vmul.f32 0.1, %v726_v4  ;;  %vm729_vm14 = vcmp.gt.f32.partialorder %v726_v4, 0.0 }
 0x27a   : > { %v732_v9 = vsel %vm728_vm13, %v724_v2, %v730_v5 }
 0x27b   : > { %v733_v7 = vsel %vm729_vm14, %v726_v4, %v731_v6 }
 0x27c   : > { %744 = vmatprep.subr.mxu0 %v733_v7 }
 0x27d   : > { %745 = vmatpush1.msra.mxu0 %v732_v9 }
 0x27e   : > { %892 = vmatmul.mubr.msk.f32.vlgmr.msra.gmra.mrb[2].mxu0 %vm342_vm0, %v734_v8 }
 0x351   : > { %v810_v11 = vpop.f32.mrb[2].mxu0 }
 0x352   : > { %v811_v12 = vadd.f32 %v810_v11, %v739_v10  ;;  %v812_v13 = vpop.f32.mrb[3].mxu0 }
 0x353   : > { %v813_v14 = vadd.f32 %v812_v13, %v739_v10 }
 0x354   : > { %vm815_vm15 = vcmp.gt.f32.partialorder %v811_v12, 0.0  ;;  %v817_v15 = vmul.f32 0.1, %v811_v12 }
 0x355   : > { %vm816_vm1 = vcmp.gt.f32.partialorder %v813_v14, 0.0  ;;  %v818_v18 = vmul.f32 0.1, %v813_v14 }
 0x356   : > { %v819_v19 = vsel %vm815_vm15, %v811_v12, %v817_v15 }
 0x357   : > { %v820_v20 = vsel %vm816_vm1, %v813_v14, %v818_v18 }
 0x358   : > { %v823_v21 = vcombine.low %v819_v19, %v820_v20 }
 0x35a   : > { %825 = vst [vmem:[%s332_s24] sm:$0xff] %v823_v21 }
 0x35b PF: > { %s19_s30 = sadd.s32 1, %s941_s30  }
 0x35c   : > { %p16_p4 = scmp.ge.s32.totalorder %s19_s30, 4  }
 0x35e   :  { %18 = sbr.rel (!%p16_p4) target bundleno = 1 (0x1), region = 86 }

</bundles_post_ra>
